<compile_context>
chip_gen: v7x
topology: tpu7x:2x2x1
jax: 0.10.0
libtpu: 0.0.40
codegen_flags: <defaults>
</compile_context>

<pallas_src>
import functools

import jax
import jax.numpy as jnp
from jax.experimental import pallas as pl
from jax.experimental.pallas import tpu as pltpu


def _round_up(n, m):
    return ((n + m - 1) // m) * m


def _sublane_granule(dtype):
    # f32 -> 8, bf16 -> 16, int8/fp8 -> 32 (sub-32-bit dtypes pack sublanes).
    return max(8, 32 // jnp.dtype(dtype).itemsize)


def _pick_tile(total, granule, cap):
    """Largest multiple of `granule` that divides `total` and is <= cap."""
    assert total % granule == 0
    q = total // granule
    best = granule
    d = 1
    while d * d <= q:
        if q % d == 0:
            for f in (d, q // d):
                t = f * granule
                if best < t <= cap:
                    best = t
        d += 1
    return best


def _linear_small_kernel(x_ref, w_ref, b_ref, o_ref):
    # Whole problem resident in VMEM: single MXU matmul, f32 accumulate.
    acc = jnp.dot(x_ref[...], w_ref[...], preferred_element_type=jnp.float32)
    o_ref[...] = (acc + b_ref[...]).astype(o_ref.dtype)


def _linear_kernel(x_ref, w_ref, b_ref, o_ref, acc_ref):
    # x_ref : (tm, tk)  w_ref : (tk, tn)  b_ref : (1, tn)
    # o_ref : (tm, tn)  acc_ref : (tm, tn) f32 scratch (resident over K).
    k = pl.program_id(2)

    @pl.when(k == 0)
    def _():
        acc_ref[...] = jnp.zeros_like(acc_ref)

    acc_ref[...] += jnp.dot(x_ref[...], w_ref[...],
                            preferred_element_type=jnp.float32)

    @pl.when(k == pl.num_programs(2) - 1)
    def _():
        # Bias add + cast once, at finalize (single HBM writeback).
        o_ref[...] = (acc_ref[...] + b_ref[...]).astype(o_ref.dtype)


@functools.partial(jax.jit,
                   static_argnames=("operand_dtype", "small_path_max_bytes"))
def classifier_forward(x, weight, bias, *, operand_dtype=jnp.bfloat16,
                       small_path_max_bytes=6 * 1024 * 1024):
    """Pallas equivalent of Classifier.forward.

    x      : (B, C, H, W) (or any (B, ...) shape)
    weight : (num_classes, input_dim)  -- native PyTorch nn.Linear layout
    bias   : (num_classes,)
    returns: (B, num_classes) in x.dtype
    """
    B = x.shape[0]
    x2d = x.reshape(B, -1)                       # x.view(x.size(0), -1)
    D = x2d.shape[1]
    C = weight.shape[0]
    assert weight.shape[1] == D

    out_dtype = x2d.dtype
    op_dtype = jnp.dtype(operand_dtype)
    op_bytes = op_dtype.itemsize
    out_bytes = jnp.dtype(out_dtype).itemsize

    # Sublane granule for the batch axis: must satisfy both the (bf16) operand
    # tile and the (possibly f32) output tile.
    sub_g = max(_sublane_granule(op_dtype), _sublane_granule(out_dtype))

    # ---- pad only to hardware granules (no tile-multiple padding) ----------
    B_pad = _round_up(B, sub_g)
    D_pad = _round_up(D, 128)
    C_pad = _round_up(C, 128)

    # Cast operands; transpose W to (D, C) -- fuses with the cast copy, and
    # removes any per-step transpose on the MXU RHS inside the kernel.
    x_p = x2d.astype(op_dtype)
    w_t = weight.astype(op_dtype).T              # (D, C)
    b_f = bias.astype(jnp.float32)

    if (B_pad, D_pad) != (B, D):
        x_p = jnp.pad(x_p, ((0, B_pad - B), (0, D_pad - D)))
    if (D_pad, C_pad) != (D, C):
        w_t = jnp.pad(w_t, ((0, D_pad - D), (0, C_pad - C)))
    if C_pad != C:
        b_f = jnp.pad(b_f, (0, C_pad - C))
    b2d = b_f.reshape(1, C_pad)

    # ---- single-invocation fast path for small problems --------------------
    small_bytes = ((B_pad * D_pad + D_pad * C_pad) * op_bytes
                   + B_pad * C_pad * out_bytes + C_pad * 4)
    if small_bytes <= small_path_max_bytes:
        out = pl.pallas_call(
            _linear_small_kernel,
            out_shape=jax.ShapeDtypeStruct((B_pad, C_pad), out_dtype),
            grid=(1,),
            in_specs=[
                pl.BlockSpec((B_pad, D_pad), lambda i: (0, 0)),
                pl.BlockSpec((D_pad, C_pad), lambda i: (0, 0)),
                pl.BlockSpec((1, C_pad), lambda i: (0, 0)),
            ],
            out_specs=pl.BlockSpec((B_pad, C_pad), lambda i: (0, 0)),
            compiler_params=pltpu.CompilerParams(
                dimension_semantics=("arbitrary",),
                vmem_limit_bytes=32 * 1024 * 1024,
            ),
        )(x_p, w_t, b2d)
        return out[:B, :C]

    # ---- tiled path ---------------------------------------------------------
    # Tiles divide the (granule-)padded dims exactly -> no extra pad copies.
    tm = _pick_tile(B_pad, sub_g, 512)
    tn = _pick_tile(C_pad, 128, 512)
    tk = _pick_tile(D_pad, 128, 2048)

    # v7x has 2 TensorCores: if both parallel axes would have extent 1, split
    # the class axis so the second core gets work.
    if B_pad == tm and C_pad == tn and C_pad >= 256:
        tn = _pick_tile(C_pad, 128, C_pad // 2)

    grid = (B_pad // tm, C_pad // tn, D_pad // tk)

    cost = pl.CostEstimate(
        flops=2 * B_pad * D_pad * C_pad,
        transcendentals=0,
        bytes_accessed=(B_pad * D_pad * op_bytes * (C_pad // tn)     # x re-reads
                        + D_pad * C_pad * op_bytes * (B_pad // tm)   # W re-reads
                        + B_pad * C_pad * out_bytes
                        + C_pad * 4),
    )

    out = pl.pallas_call(
        _linear_kernel,
        out_shape=jax.ShapeDtypeStruct((B_pad, C_pad), out_dtype),
        grid=grid,
        in_specs=[
            pl.BlockSpec((tm, tk), lambda i, j, k: (i, k)),   # x tile
            pl.BlockSpec((tk, tn), lambda i, j, k: (k, j)),   # W^T tile (D, C)
            pl.BlockSpec((1, tn), lambda i, j, k: (0, j)),    # bias tile
        ],
        out_specs=pl.BlockSpec((tm, tn), lambda i, j, k: (i, j)),
        scratch_shapes=[pltpu.VMEM((tm, tn), jnp.float32)],
        compiler_params=pltpu.CompilerParams(
            # B and C axes shard across TensorCores; reduction is sequential.
            dimension_semantics=("parallel", "parallel", "arbitrary"),
            vmem_limit_bytes=48 * 1024 * 1024,
        ),
        cost_estimate=cost,
    )(x_p, w_t, b2d)

    return out[:B, :C]


if __name__ == "__main__":
    key = jax.random.PRNGKey(0)
    k_x, k_w, k_b = jax.random.split(key, 3)

    # Shapes consistent with the module: x is (B, C, H, W), D = C*H*W.
    B, Cc, H, W = 2, 4, 16, 16
    input_dim = Cc * H * W          # 1024
    num_classes = 8

    x = jax.random.normal(k_x, (B, Cc, H, W), dtype=jnp.float32)

    # Deterministic synthetic parameters (nn.Linear-style uniform init bound).
    bound = 1.0 / jnp.sqrt(jnp.float32(input_dim))
    weight = jax.random.uniform(k_w, (num_classes, input_dim),
                                dtype=jnp.float32, minval=-bound, maxval=bound)
    bias = jax.random.uniform(k_b, (num_classes,),
                              dtype=jnp.float32, minval=-bound, maxval=bound)

    # Reference in plain JAX (same math as torch: x.view(B,-1) @ W.T + b).
    ref = x.reshape(B, -1) @ weight.T + bias

    # 1) Default path (bf16 operand streaming; these shapes hit the fast path).
    out = jax.block_until_ready(classifier_forward(x, weight, bias))
    assert out.shape == (B, num_classes)
    assert jnp.allclose(out, ref, atol=2e-2, rtol=2e-2)

    # 2) Force the tiled (grid) path to exercise it on the same shapes.
    out_tiled = jax.block_until_ready(
        classifier_forward(x, weight, bias, small_path_max_bytes=0))
    assert out_tiled.shape == (B, num_classes)
    assert jnp.allclose(out_tiled, ref, atol=2e-2, rtol=2e-2)

    # 3) Exact-precision path (f32 operands) for a tight numerical check.
    out_f32 = jax.block_until_ready(
        classifier_forward(x, weight, bias, operand_dtype=jnp.float32))
    assert jnp.allclose(out_f32, ref, atol=1e-4, rtol=1e-4)

    print("KERNEL_OK")
</pallas_src>

<mosaic_0001>
module attributes {stable_mosaic.version = 11 : i64} {
  func.func @_linear_small_kernel(%arg0: i32, %arg1: memref<16x1024xbf16, #tpu.memory_space<vmem>>, %arg2: memref<1024x128xbf16, #tpu.memory_space<vmem>>, %arg3: memref<1x128xf32, #tpu.memory_space<vmem>>, %arg4: memref<16x128xf32, #tpu.memory_space<vmem>>) attributes {dimension_semantics = [#tpu.dimension_semantics<arbitrary>], iteration_bounds = array<i64: 1>, scalar_prefetch = 0 : i64, scratch_operands = 0 : i64, tpu.core_type = #tpu.core_type<tc>, window_params = [{pipeline_mode = #tpu.pipeline_mode<synchronous>, transform_indices = @transform_0, window_bounds = array<i64: 16, 1024>}, {pipeline_mode = #tpu.pipeline_mode<synchronous>, transform_indices = @transform_1, window_bounds = array<i64: 1024, 128>}, {pipeline_mode = #tpu.pipeline_mode<synchronous>, transform_indices = @transform_2, window_bounds = array<i64: 1, 128>}, {pipeline_mode = #tpu.pipeline_mode<synchronous>, transform_indices = @transform_3, window_bounds = array<i64: 16, 128>}]} {
    %c0 = arith.constant 0 : index
    %c0_0 = arith.constant 0 : index
    %0 = vector.load %arg1[%c0, %c0_0] : memref<16x1024xbf16, #tpu.memory_space<vmem>>, vector<16x1024xbf16>
    %c0_1 = arith.constant 0 : index
    %c0_2 = arith.constant 0 : index
    %1 = vector.load %arg2[%c0_1, %c0_2] : memref<1024x128xbf16, #tpu.memory_space<vmem>>, vector<1024x128xbf16>
    %cst = arith.constant dense<0.000000e+00> : vector<16x128xf32>
    %2 = tpu.matmul %0, %1, %cst {dimension_numbers = #tpu.dot_dimension_numbers<[1], [0], [0], [1], [0, 0, 1, 1], [], []>} : vector<16x1024xbf16>, vector<1024x128xbf16>, vector<16x128xf32> -> vector<16x128xf32>
    %c0_3 = arith.constant 0 : index
    %c0_4 = arith.constant 0 : index
    %3 = vector.load %arg3[%c0_3, %c0_4] : memref<1x128xf32, #tpu.memory_space<vmem>>, vector<1x128xf32>
    %4 = vector.broadcast %3 : vector<1x128xf32> to vector<16x128xf32>
    %5 = arith.addf %2, %4 : vector<16x128xf32>
    %c0_5 = arith.constant 0 : index
    %c0_6 = arith.constant 0 : index
    %6 = vector.load %arg4[%c0_5, %c0_6] : memref<16x128xf32, #tpu.memory_space<vmem>>, vector<16x128xf32>
    tpu.vector_store %arg4[%c0_5, %c0_6], %5 {strides = array<i32>} : memref<16x128xf32, #tpu.memory_space<vmem>>, vector<16x128xf32>,
    return
  }
  func.func @transform_0(%arg0: i32) -> (i32, i32) {
    %c0_i32 = arith.constant 0 : i32
    %c0_i32_0 = arith.constant 0 : i32
    %c0_i32_1 = arith.constant 0 : i32
    return %c0_i32, %c0_i32_0 : i32, i32
  }
  func.func @transform_1(%arg0: i32) -> (i32, i32) {
    %c0_i32 = arith.constant 0 : i32
    %c0_i32_0 = arith.constant 0 : i32
    %c0_i32_1 = arith.constant 0 : i32
    return %c0_i32, %c0_i32_0 : i32, i32
  }
  func.func @transform_2(%arg0: i32) -> (i32, i32) {
    %c0_i32 = arith.constant 0 : i32
    %c0_i32_0 = arith.constant 0 : i32
    %c0_i32_1 = arith.constant 0 : i32
    return %c0_i32, %c0_i32_0 : i32, i32
  }
  func.func @transform_3(%arg0: i32) -> (i32, i32) {
    %c0_i32 = arith.constant 0 : i32
    %c0_i32_0 = arith.constant 0 : i32
    %c0_i32_1 = arith.constant 0 : i32
    return %c0_i32, %c0_i32_0 : i32, i32
  }
}

</mosaic_0001>

<bundles_post_ra>
// kernel: classifier_forward.1
= control target key start
LH: loop header
LB: loop body
LE: loop exit
PB: predicated region body
PF: predicated region fallthrough
CT: control target
= control target key end

     0   :  { %s1222_s1 = inlined_call_operand.vmem [shape: bf16[1024,128], index: 1, kind: input, shape index: {}]   ;;  %s1223_s0 = inlined_call_operand.vmem [shape: bf16[16,1024], index: 0, kind: input, shape index: {}]   ;;  %s1224_s2 = inlined_call_operand.vmem [shape: f32[1,128], index: 2, kind: input, shape index: {}]   ;;  %s1225_s3 = inlined_call_operand.vmem [shape: f32[16,128], index: 3, kind: output, shape index: {}]  }
   0x1   :  { %v913_v0 = vld [vmem:[%s1222_s1 + $0x40] sm:$0xff]   ;;  %v917_v4 = vld [vmem:[%s1222_s1 + $0x48] sm:$0xff]   ;;  %v921_v8 = vld [vmem:[%s1222_s1 + $0x50] sm:$0xff]  }
   0x2   :  { %v914_v1 = vld [vmem:[%s1222_s1 + $0xc0] sm:$0xff]   ;;  %825 = vmatprep.subr.bf16.mxu0 %v913_v0  ;;  %v918_v5 = vld [vmem:[%s1222_s1 + $0xc8] sm:$0xff]   ;;  %v922_v9 = vld [vmem:[%s1222_s1 + $0xd0] sm:$0xff]  }
   0x3   :  { %v915_v2 = vld [vmem:[%s1222_s1] sm:$0xff]   ;;  %847 = vmatprep.subr.bf16.mxu1 %v914_v1  ;;  %v919_v6 = vld [vmem:[%s1222_s1 + $0x8] sm:$0xff]   ;;  %v923_v10 = vld [vmem:[%s1222_s1 + $0x10] sm:$0xff]  }
   0x4   :  { %v916_v3 = vld [vmem:[%s1222_s1 + $0x80] sm:$0xff]   ;;  %826 = vmatpush3.bf16.msra.mxu0 %v915_v2  ;;  %v920_v7 = vld [vmem:[%s1222_s1 + $0x88] sm:$0xff]   ;;  %v924_v11 = vld [vmem:[%s1222_s1 + $0x90] sm:$0xff]  }
   0x5   :  { %848 = vmatpush3.bf16.msra.mxu1 %v916_v3  ;;  %827 = vmatprep.subr.bf16.mxu0 %v917_v4  ;;  %v925_v12 = vld [vmem:[%s1222_s1 + $0x58] sm:$0xff]   ;;  %v929_v16 = vld [vmem:[%s1222_s1 + $0x60] sm:$0xff]   ;;  %v933_v20 = vld [vmem:[%s1222_s1 + $0x68] sm:$0xff]  }
   0x6   :  { %849 = vmatprep.subr.bf16.mxu1 %v918_v5  ;;  %v926_v13 = vld [vmem:[%s1222_s1 + $0xd8] sm:$0xff]   ;;  %v930_v17 = vld [vmem:[%s1222_s1 + $0xe0] sm:$0xff]   ;;  %v934_v21 = vld [vmem:[%s1222_s1 + $0xe8] sm:$0xff]  }
   0x7   :  { %v927_v14 = vld [vmem:[%s1222_s1 + $0x18] sm:$0xff]   ;;  %v931_v18 = vld [vmem:[%s1222_s1 + $0x20] sm:$0xff]   ;;  %v935_v22 = vld [vmem:[%s1222_s1 + $0x28] sm:$0xff]  }
   0x8   :  { %828 = vmatpush3.bf16.msra.mxu0 %v919_v6  ;;  %v928_v15 = vld [vmem:[%s1222_s1 + $0x98] sm:$0xff]   ;;  %v932_v19 = vld [vmem:[%s1222_s1 + $0xa0] sm:$0xff]   ;;  %v936_v23 = vld [vmem:[%s1222_s1 + $0xa8] sm:$0xff]  }
   0x9   :  { %850 = vmatpush3.bf16.msra.mxu1 %v920_v7  ;;  %829 = vmatprep.subr.bf16.mxu0 %v921_v8  ;;  %v937_v24 = vld [vmem:[%s1222_s1 + $0x70] sm:$0xff]   ;;  %v941_v28 = vld [vmem:[%s1222_s1 + $0x78] sm:$0xff]   ;;  %v15_v32 = vld [vmem:[%s1223_s0] sm:$0xff] }
   0xa   :  { %851 = vmatprep.subr.bf16.mxu1 %v922_v9  ;;  %v938_v25 = vld [vmem:[%s1222_s1 + $0xf0] sm:$0xff]   ;;  %v942_v29 = vld [vmem:[%s1222_s1 + $0xf8] sm:$0xff]   ;;  %v19_v33 = vld [vmem:[%s1223_s0 + $0x20] sm:$0xff] }
   0xb   :  { %v939_v26 = vld [vmem:[%s1222_s1 + $0x30] sm:$0xff]   ;;  %v943_v30 = vld [vmem:[%s1222_s1 + $0x38] sm:$0xff]   ;;  %v16_v34 = vld [vmem:[%s1223_s0 + $0x8] sm:$0xff]  ;;  %v753_v35 = vcombine.low %v15_v32, %v19_v33  ;;  %v754_v36 = vcombine.high %v15_v32, %v19_v33 }
   0xc   :  { %830 = vmatpush3.bf16.msra.mxu0 %v923_v10  ;;  %v940_v27 = vld [vmem:[%s1222_s1 + $0xb0] sm:$0xff]   ;;  %v944_v31 = vld [vmem:[%s1222_s1 + $0xb8] sm:$0xff]   ;;  %v20_v37 = vld [vmem:[%s1223_s0 + $0x28] sm:$0xff] }
   0xd   :  { %852 = vmatpush3.bf16.msra.mxu1 %v924_v11  ;;  %831 = vmatprep.subr.bf16.mxu0 %v925_v12  ;;  %v755_v38 = vcombine.low %v16_v34, %v20_v37  ;;  %v756_v39 = vcombine.high %v16_v34, %v20_v37  ;;  %v945_v40 = vld [vmem:[%s1222_s1 + $0x140] sm:$0xff]   ;;  %v949_v44 = vld [vmem:[%s1222_s1 + $0x148] sm:$0xff]   ;;  %v953_v48 = vld [vmem:[%s1222_s1 + $0x150] sm:$0xff]  }
   0xe   :  { %853 = vmatprep.subr.bf16.mxu1 %v926_v13  ;;  %614 = vmatprep.mubr.bf16.mxu0 %v754_v36  ;;  %v946_v41 = vld [vmem:[%s1222_s1 + $0x1c0] sm:$0xff]   ;;  %v950_v45 = vld [vmem:[%s1222_s1 + $0x1c8] sm:$0xff]   ;;  %v954_v49 = vld [vmem:[%s1222_s1 + $0x1d0] sm:$0xff]  }
   0xf   :  { %655 = vmatprep.mubr.bf16.mxu1 %v756_v39  ;;  %v947_v42 = vld [vmem:[%s1222_s1 + $0x100] sm:$0xff]   ;;  %v951_v46 = vld [vmem:[%s1222_s1 + $0x108] sm:$0xff]   ;;  %v955_v50 = vld [vmem:[%s1222_s1 + $0x110] sm:$0xff]  }
  0x10   :  { %832 = vmatpush3.bf16.msra.mxu0 %v927_v14  ;;  %v948_v43 = vld [vmem:[%s1222_s1 + $0x180] sm:$0xff]   ;;  %v952_v47 = vld [vmem:[%s1222_s1 + $0x188] sm:$0xff]   ;;  %v956_v51 = vld [vmem:[%s1222_s1 + $0x190] sm:$0xff]  }
  0x11   :  { %854 = vmatpush3.bf16.msra.mxu1 %v928_v15  ;;  %833 = vmatprep.subr.bf16.mxu0 %v929_v16  ;;  %v957_v52 = vld [vmem:[%s1222_s1 + $0x158] sm:$0xff]   ;;  %v961_v56 = vld [vmem:[%s1222_s1 + $0x160] sm:$0xff]   ;;  %v965_v60 = vld [vmem:[%s1222_s1 + $0x168] sm:$0xff]  }
  0x12   :  { %855 = vmatprep.subr.bf16.mxu1 %v930_v17  ;;  %v958_v53 = vld [vmem:[%s1222_s1 + $0x1d8] sm:$0xff]   ;;  %v962_v57 = vld [vmem:[%s1222_s1 + $0x1e0] sm:$0xff]   ;;  %v966_v61 = vld [vmem:[%s1222_s1 + $0x1e8] sm:$0xff]  }
  0x13   :  { %v959_v54 = vld [vmem:[%s1222_s1 + $0x118] sm:$0xff]   ;;  %v963_v58 = vld [vmem:[%s1222_s1 + $0x120] sm:$0xff]   ;;  %v967_v62 = vld [vmem:[%s1222_s1 + $0x128] sm:$0xff]  }
  0x14   :  { %834 = vmatpush3.bf16.msra.mxu0 %v931_v18  ;;  %v960_v55 = vld [vmem:[%s1222_s1 + $0x198] sm:$0xff]   ;;  %v964_v59 = vld [vmem:[%s1222_s1 + $0x1a0] sm:$0xff]   ;;  %v968_v63 = vld [vmem:[%s1222_s1 + $0x1a8] sm:$0xff]  }
  0x15   :  { %856 = vmatpush3.bf16.msra.mxu1 %v932_v19  ;;  %835 = vmatprep.subr.bf16.mxu0 %v933_v20  ;;  %v969_v0 = vld [vmem:[%s1222_s1 + $0x170] sm:$0xff]   ;;  %v973_v4 = vld [vmem:[%s1222_s1 + $0x178] sm:$0xff]   ;;  %v752_v18 = vld [vmem:[%s1224_s2] ss:$0 sm:$0xff] }
  0x16   :  { %857 = vmatprep.subr.bf16.mxu1 %v934_v21  ;;  %v970_v1 = vld [vmem:[%s1222_s1 + $0x1f0] sm:$0xff]   ;;  %v974_v5 = vld [vmem:[%s1222_s1 + $0x1f8] sm:$0xff]  }
  0x17   :  { %v971_v2 = vld [vmem:[%s1222_s1 + $0x130] sm:$0xff]   ;;  %v975_v6 = vld [vmem:[%s1222_s1 + $0x138] sm:$0xff]  }
  0x18   :  { %836 = vmatpush3.bf16.msra.mxu0 %v935_v22  ;;  %v972_v3 = vld [vmem:[%s1222_s1 + $0x1b0] sm:$0xff]   ;;  %v976_v7 = vld [vmem:[%s1222_s1 + $0x1b8] sm:$0xff]  }
  0x19   :  { %858 = vmatpush3.bf16.msra.mxu1 %v936_v23  ;;  %837 = vmatprep.subr.bf16.mxu0 %v937_v24  ;;  %v17_v8 = vld [vmem:[%s1223_s0 + $0x10] sm:$0xff]  ;;  %v18_v12 = vld [vmem:[%s1223_s0 + $0x18] sm:$0xff] }
  0x1a   :  { %859 = vmatprep.subr.bf16.mxu1 %v938_v25  ;;  %v21_v9 = vld [vmem:[%s1223_s0 + $0x30] sm:$0xff]  ;;  %v22_v13 = vld [vmem:[%s1223_s0 + $0x38] sm:$0xff] }
  0x1b   :  { %v757_v10 = vcombine.low %v17_v8, %v21_v9  ;;  %v758_v11 = vcombine.high %v17_v8, %v21_v9  ;;  %v759_v14 = vcombine.low %v18_v12, %v22_v13  ;;  %v760_v15 = vcombine.high %v18_v12, %v22_v13 }
  0x1c   :  { %838 = vmatpush3.bf16.msra.mxu0 %v939_v26 }
  0x1d   :  { %860 = vmatpush3.bf16.msra.mxu1 %v940_v27  ;;  %839 = vmatprep.subr.bf16.mxu0 %v941_v28 }
  0x1e   :  { %861 = vmatprep.subr.bf16.mxu1 %v942_v29 }
  0x20   :  { %840 = vmatpush3.bf16.msra.mxu0 %v943_v30 }
  0x21   :  { %862 = vmatpush3.bf16.msra.mxu1 %v944_v31  ;;  %869 = vmatprep.subr.bf16.mxu0 %v945_v40 }
  0x22   :  { %891 = vmatprep.subr.bf16.mxu1 %v946_v41 }
  0x23   :  { %615 = vmatmul.mubr.bf16.vlgmr.msra.gmra.mrb[0].mxu0 %v753_v35 }
  0x24   :  { %656 = vmatmul.mubr.bf16.vlgmr.msra.gmra.mrb[0].mxu1 %v755_v38  ;;  %870 = vmatpush3.bf16.msra.mxu0 %v947_v42 }
  0x25   :  { %892 = vmatpush3.bf16.msra.mxu1 %v948_v43  ;;  %871 = vmatprep.subr.bf16.mxu0 %v949_v44 }
  0x26   :  { %893 = vmatprep.subr.bf16.mxu1 %v950_v45  ;;  %696 = vmatprep.mubr.bf16.mxu0 %v758_v11 }
  0x27   :  { %737 = vmatprep.mubr.bf16.mxu1 %v760_v15 }
  0x28   :  { %872 = vmatpush3.bf16.msra.mxu0 %v951_v46 }
  0x29   :  { %894 = vmatpush3.bf16.msra.mxu1 %v952_v47  ;;  %873 = vmatprep.subr.bf16.mxu0 %v953_v48 }
  0x2a   :  { %895 = vmatprep.subr.bf16.mxu1 %v954_v49 }
  0x2c   :  { %874 = vmatpush3.bf16.msra.mxu0 %v955_v50 }
  0x2d   :  { %896 = vmatpush3.bf16.msra.mxu1 %v956_v51  ;;  %875 = vmatprep.subr.bf16.mxu0 %v957_v52 }
  0x2e   :  { %897 = vmatprep.subr.bf16.mxu1 %v958_v53 }
  0x30   :  { %876 = vmatpush3.bf16.msra.mxu0 %v959_v54 }
  0x31   :  { %898 = vmatpush3.bf16.msra.mxu1 %v960_v55  ;;  %877 = vmatprep.subr.bf16.mxu0 %v961_v56 }
  0x32   :  { %899 = vmatprep.subr.bf16.mxu1 %v962_v57 }
  0x34   :  { %878 = vmatpush3.bf16.msra.mxu0 %v963_v58 }
  0x35   :  { %900 = vmatpush3.bf16.msra.mxu1 %v964_v59  ;;  %879 = vmatprep.subr.bf16.mxu0 %v965_v60 }
  0x36   :  { %901 = vmatprep.subr.bf16.mxu1 %v966_v61 }
  0x38   :  { %880 = vmatpush3.bf16.msra.mxu0 %v967_v62 }
  0x39   :  { %902 = vmatpush3.bf16.msra.mxu1 %v968_v63  ;;  %881 = vmatprep.subr.bf16.mxu0 %v969_v0 }
  0x3a   :  { %903 = vmatprep.subr.bf16.mxu1 %v970_v1 }
  0x3c   :  { %882 = vmatpush3.bf16.msra.mxu0 %v971_v2 }
  0x3d   :  { %904 = vmatpush3.bf16.msra.mxu1 %v972_v3  ;;  %883 = vmatprep.subr.bf16.mxu0 %v973_v4 }
  0x3e   :  { %905 = vmatprep.subr.bf16.mxu1 %v974_v5 }
  0x40   :  { %884 = vmatpush3.bf16.msra.mxu0 %v975_v6 }
  0x41   :  { %906 = vmatpush3.bf16.msra.mxu1 %v976_v7 }
  0x43   :  { %697 = vmatmul.mubr.bf16.vlgmr.msra.gmra.mrb[4].mxu0 %v757_v10 }
  0x44   :  { %738 = vmatmul.mubr.bf16.vlgmr.msra.gmra.mrb[4].mxu1 %v759_v14 }
  0xf6   :  { %v841_v16 = vpop.f32.mrb[0].mxu0 }
  0xf7   :  { %v863_v17 = vpop.f32.mrb[0].mxu1  ;;  %v842_v19 = vpop.f32.mrb[1].mxu0 }
  0xf8   :  { %v843_v20 = vadd.f32 %v842_v19, %v841_v16  ;;  %v864_v21 = vpop.f32.mrb[1].mxu1  ;;  %v844_v22 = vpop.f32.mrb[2].mxu0 }
  0xf9   :  { %v865_v23 = vadd.f32 %v864_v21, %v863_v17  ;;  %v866_v24 = vpop.f32.mrb[2].mxu1  ;;  %v845_v25 = vpop.f32.mrb[3].mxu0 }
  0xfa   :  { %v617_v26 = vadd.f32 %v843_v20, %v752_v18  ;;  %v846_v27 = vadd.f32 %v845_v25, %v844_v22  ;;  %v867_v28 = vpop.f32.mrb[3].mxu1 }
  0xfb   :  { %v868_v29 = vadd.f32 %v867_v28, %v866_v24 }
  0xfc   :  { %v658_v30 = vadd.f32 %v865_v23, %v617_v26  ;;  %v620_v31 = vadd.f32 %v846_v27, %v752_v18 }
  0xfe   :  { %v661_v32 = vadd.f32 %v868_v29, %v620_v31 }
 0x116   :  { %v885_v33 = vpop.f32.mrb[4].mxu0 }
 0x117   :  { %v907_v34 = vpop.f32.mrb[4].mxu1  ;;  %v886_v35 = vpop.f32.mrb[5].mxu0 }
 0x118   :  { %v887_v36 = vadd.f32 %v886_v35, %v885_v33  ;;  %v908_v37 = vpop.f32.mrb[5].mxu1  ;;  %v888_v38 = vpop.f32.mrb[6].mxu0 }
 0x119   :  { %v909_v39 = vadd.f32 %v908_v37, %v907_v34  ;;  %v910_v40 = vpop.f32.mrb[6].mxu1  ;;  %v889_v41 = vpop.f32.mrb[7].mxu0 }
 0x11a   :  { %v699_v42 = vadd.f32 %v887_v36, %v658_v30  ;;  %v890_v43 = vadd.f32 %v889_v41, %v888_v38  ;;  %v911_v44 = vpop.f32.mrb[7].mxu1 }
 0x11b   :  { %v912_v45 = vadd.f32 %v911_v44, %v910_v40 }
 0x11c   :  { %v740_v46 = vadd.f32 %v909_v39, %v699_v42  ;;  %v702_v47 = vadd.f32 %v890_v43, %v661_v32 }
 0x11e   :  { %746 = vst [vmem:[%s1225_s3] sm:$0xff] %v740_v46  ;;  %v743_v48 = vadd.f32 %v912_v45, %v702_v47 }
 0x120   :  { %747 = vst [vmem:[%s1225_s3 + $0x8] sm:$0xff] %v743_v48 }

</bundles_post_ra>
